<compile_context>
chip_gen: v7x
topology: tpu7x:2x2x1
jax: 0.10.0
libtpu: 0.0.40
codegen_flags: <defaults>
</compile_context>

<pallas_src>
import math
import functools

import jax
import jax.numpy as jnp
from jax.experimental import pallas as pl
from jax.experimental.pallas import tpu as pltpu


def _round_up(x, m):
    return ((x + m - 1) // m) * m


# ----------------------------- Pallas kernel --------------------------------

def _embed_ln_kernel(x_ref, ids_ref, w_ref, b_ref, tbl_ref, gamma_ref, beta_ref,
                     o_ref, *, eps, h_true, n_pos, n_bins, apply_ln):
    # x_ref:     (tm, D)       token features (gathered / masked in glue)
    # ids_ref:   (tm, 3) int32 [position id, in-degree bin, out-degree bin]
    # w_ref:     (D, Hp)       embedding weight (lane-padded)
    # b_ref:     (1, Hp) f32   embedding bias
    # tbl_ref:   (K2, Hp)      fused table [pos_emb[:L]; in_deg_emb; out_deg_emb]
    # gamma/beta:(1, Hp) f32   LayerNorm affine (zero-padded lanes)
    x = x_ref[...]
    tm = x.shape[0]
    k2 = n_pos + 2 * n_bins
    h_pad = o_ref.shape[-1]

    # One-hot "gather" of the three table rows per token.  The three id ranges
    # are disjoint inside the fused table, so a single OR-ed one-hot matmul
    # yields pos_emb + in_deg_emb + out_deg_emb in one MXU pass.
    col = jax.lax.broadcasted_iota(jnp.int32, (tm, k2), 1)
    sel = ((col == ids_ref[:, 0:1])
           | (col == ids_ref[:, 1:2] + n_pos)
           | (col == ids_ref[:, 2:3] + (n_pos + n_bins)))
    onehot = sel.astype(x.dtype)

    y = jnp.dot(x, w_ref[...], preferred_element_type=jnp.float32)
    y = y + jnp.dot(onehot, tbl_ref[...], preferred_element_type=jnp.float32)
    y = y + b_ref[...]

    if apply_ln:
        inv_h = 1.0 / float(h_true)
        if h_pad != h_true:
            lane = jax.lax.broadcasted_iota(jnp.int32, (1, h_pad), 1)
            lmask = (lane < h_true).astype(jnp.float32)
            y = y * lmask                      # keep padded lanes out of stats
        mean = jnp.sum(y, axis=-1, keepdims=True) * inv_h
        cen = y - mean
        if h_pad != h_true:
            cen = cen * lmask
        var = jnp.sum(cen * cen, axis=-1, keepdims=True) * inv_h
        scale = gamma_ref[...] * jax.lax.rsqrt(var + eps)   # gamma folded in
        y = cen * scale + beta_ref[...]
    o_ref[...] = y.astype(o_ref.dtype)


def graphbert_embed_fused(x_flat, ids, w, b, tbl, gamma, beta, *,
                          h_true, n_pos, n_bins, eps=1e-5, tm=256,
                          apply_ln=True, out_dtype=jnp.float32):
    M, D = x_flat.shape
    H_pad = w.shape[1]
    K2 = tbl.shape[0]
    assert K2 == n_pos + 2 * n_bins

    # tile rows; pad M up to a multiple of the tile (sliced off on return)
    tm_eff = min(tm, _round_up(max(M, 1), 8))
    M_pad = _round_up(M, tm_eff)
    if M_pad != M:
        x_flat = jnp.pad(x_flat, ((0, M_pad - M), (0, 0)))
        ids = jnp.pad(ids, ((0, M_pad - M), (0, 0)))
    grid = (M_pad // tm_eff,)

    def _isz(a):
        return jnp.dtype(a.dtype).itemsize

    out_isz = jnp.dtype(out_dtype).itemsize
    bytes_accessed = (M_pad * D * _isz(x_flat) + M_pad * 3 * 4
                      + M_pad * H_pad * out_isz
                      + D * H_pad * _isz(w) + K2 * H_pad * _isz(tbl)
                      + 3 * H_pad * 4)
    cost = pl.CostEstimate(flops=int(2 * M_pad * (D + K2) * H_pad),
                           transcendentals=int(M_pad),
                           bytes_accessed=int(bytes_accessed))

    # rough VMEM footprint: double-buffered per-tile streams + resident params
    vmem_need = (2 * (tm_eff * D * _isz(x_flat) + tm_eff * 3 * 4
                      + tm_eff * H_pad * out_isz)
                 + 2 * (D * H_pad * _isz(w) + K2 * H_pad * _isz(tbl)
                        + 3 * H_pad * 4))
    cp_kwargs = dict(dimension_semantics=("parallel",))
    if vmem_need > (30 << 20):
        cp_kwargs["vmem_limit_bytes"] = int(min(vmem_need * 3 // 2, 127 << 20))

    kern = functools.partial(_embed_ln_kernel, eps=eps, h_true=h_true,
                             n_pos=n_pos, n_bins=n_bins, apply_ln=apply_ln)
    out = pl.pallas_call(
        kern,
        out_shape=jax.ShapeDtypeStruct((M_pad, H_pad), out_dtype),
        grid_spec=pltpu.PrefetchScalarGridSpec(
            num_scalar_prefetch=0,
            grid=grid,
            in_specs=[
                pl.BlockSpec((tm_eff, D), lambda i: (i, 0)),      # x tile
                pl.BlockSpec((tm_eff, 3), lambda i: (i, 0)),      # ids tile
                pl.BlockSpec((D, H_pad), lambda i: (0, 0)),       # W (resident)
                pl.BlockSpec((1, H_pad), lambda i: (0, 0)),       # bias
                pl.BlockSpec((K2, H_pad), lambda i: (0, 0)),      # fused table
                pl.BlockSpec((1, H_pad), lambda i: (0, 0)),       # gamma
                pl.BlockSpec((1, H_pad), lambda i: (0, 0)),       # beta
            ],
            out_specs=pl.BlockSpec((tm_eff, H_pad), lambda i: (i, 0)),
        ),
        compiler_params=pltpu.CompilerParams(**cp_kwargs),
        cost_estimate=cost,
    )(x_flat, ids, w, b, tbl, gamma, beta)
    return out[:M]


# ---------------------- module logic (glue in plain JAX) --------------------

def create_logarithmic_bins(max_degree=10000, base=2):
    n = 0
    bins = []
    current = 0
    while current <= max_degree:
        lower = current
        next_bound = int(math.pow(base, n + 1)) - 1
        upper = min(next_bound, max_degree)
        bins.append((lower, upper))
        current = upper + 1
        n += 1
    bin_edges = jnp.array([bu for (_, bu) in bins], dtype=jnp.int32)
    return bins, bin_edges


def get_bin_id_from_degree(node_degree, bin_edges):
    cmp = (node_degree[:, None] <= bin_edges[None, :]).astype(jnp.int32)
    return jnp.argmax(cmp, axis=1)


class GraphBertEmbeddingsPallas:
    """Pretrain-path forward (add_cls=False) matching the PyTorch module."""

    def __init__(self, in_dim, hidden_dim, max_length, key,
                 merge_degree=False, layer_norm=True, use_degree_emb=True,
                 bin_degree=True, bin_base=2, tm=256):
        self.in_dim = in_dim
        self.hidden_dim = hidden_dim
        self.hidden_pad = _round_up(hidden_dim, 128)   # lane-dense H
        self.layer_norm = layer_norm
        self.use_degree_emb = use_degree_emb
        self.bin_degree = bin_degree
        self.merge_degree = merge_degree
        self.tm = tm

        k = jax.random.split(key, 6)
        self.mask_token = jnp.zeros((1, in_dim), jnp.float32)   # torch.zeros
        self.cls_token = jnp.zeros((1, in_dim), jnp.float32)    # torch.zeros
        # nn.Linear(in_dim, hidden_dim): keep W as (D, H).
        self.emb_w = 0.1 * jax.random.normal(k[0], (in_dim, hidden_dim), jnp.float32)
        self.emb_b = 0.1 * jax.random.normal(k[1], (hidden_dim,), jnp.float32)
        self.position_embeddings = 0.1 * jax.random.normal(
            k[2], (1, max_length, hidden_dim), jnp.float32)
        self.ln_gamma = jnp.ones((hidden_dim,), jnp.float32)
        self.ln_beta = jnp.zeros((hidden_dim,), jnp.float32)

        _, self.bin_edges = create_logarithmic_bins(max_degree=10000, base=bin_base)
        n_bins = self.bin_edges.shape[0]
        self.in_degree_embeddings = 0.1 * jax.random.normal(
            k[3], (n_bins, hidden_dim), jnp.float32)
        self.out_degree_embeddings = 0.1 * jax.random.normal(
            k[4], (n_bins, hidden_dim), jnp.float32)
        self._rand_key = k[5]

        # lane-padded parameter copies used by the kernel (padding is zeros, so
        # padded lanes contribute nothing; LN stats are masked in-kernel).
        hp, h = self.hidden_pad, hidden_dim
        pad2 = lambda a: jnp.pad(a, ((0, 0), (0, hp - h)))
        pad1 = lambda a: jnp.pad(a, (0, hp - h)).reshape(1, hp)
        self.emb_w_p = pad2(self.emb_w)                           # (D, Hp)
        self.emb_b_p = pad1(self.emb_b)                           # (1, Hp)
        self.pos_emb_p = pad2(self.position_embeddings[0])        # (max_len, Hp)
        self.in_deg_p = pad2(self.in_degree_embeddings)           # (n_bins, Hp)
        self.out_deg_p = pad2(self.out_degree_embeddings)         # (n_bins, Hp)
        self.ln_gamma_p = pad1(self.ln_gamma)
        self.ln_beta_p = pad1(self.ln_beta)

    # ----- reference-path helper -----
    def _degree_add(self, node_in_degree, node_out_degree, walks):
        if not self.merge_degree:
            bin_in = get_bin_id_from_degree(node_in_degree, self.bin_edges)
            bin_out = get_bin_id_from_degree(node_out_degree, self.bin_edges)
            return (self.in_degree_embeddings[bin_in[walks]]
                    + self.out_degree_embeddings[bin_out[walks]])
        node_degree = node_in_degree + node_out_degree
        bin_ids = get_bin_id_from_degree(node_degree, self.bin_edges)
        return self.in_degree_embeddings[bin_ids[walks]]

    # ----- Pallas forward -----
    def forward(self, node_features, walks, mask_masked, mask_random,
                node_in_degree, node_out_degree, rng_key=None,
                stream_dtype=jnp.float32):
        b, l = walks.shape
        d, h = self.in_dim, self.hidden_dim
        key = self._rand_key if rng_key is None else rng_key
        n_bins = self.bin_edges.shape[0]

        # gather + masking (glue)
        x = node_features[walks]                                   # (B, L, D)
        x = jnp.where(mask_masked[..., None], self.mask_token[0], x)
        rand_idx = jax.random.randint(key, (b, l), 0, node_features.shape[0])
        x = jnp.where(mask_random[..., None], node_features[rand_idx], x)
        x_flat = x.reshape(b * l, d).astype(stream_dtype)

        # per-row ids: position + in/out degree bins (tiny int32 stream)
        pos_ids = jnp.broadcast_to(jnp.arange(l, dtype=jnp.int32)[None, :],
                                   (b, l)).reshape(-1)
        if self.use_degree_emb:
            if self.merge_degree:
                bins = get_bin_id_from_degree(
                    node_in_degree + node_out_degree, self.bin_edges)
                in_ids = bins[walks].reshape(-1)
                out_ids = jnp.zeros_like(in_ids)
                in_tbl, out_tbl = self.in_deg_p, jnp.zeros_like(self.out_deg_p)
            else:
                bin_in = get_bin_id_from_degree(node_in_degree, self.bin_edges)
                bin_out = get_bin_id_from_degree(node_out_degree, self.bin_edges)
                in_ids = bin_in[walks].reshape(-1)
                out_ids = bin_out[walks].reshape(-1)
                in_tbl, out_tbl = self.in_deg_p, self.out_deg_p
        else:
            in_ids = jnp.zeros((b * l,), jnp.int32)
            out_ids = jnp.zeros((b * l,), jnp.int32)
            in_tbl = jnp.zeros_like(self.in_deg_p)
            out_tbl = jnp.zeros_like(self.out_deg_p)
        ids = jnp.stack([pos_ids, in_ids.astype(jnp.int32),
                         out_ids.astype(jnp.int32)], axis=1)        # (M, 3)

        # fused small table: [pos_emb[:L]; in_deg; out_deg]  (K2, Hp)
        tbl = jnp.concatenate([self.pos_emb_p[:l], in_tbl, out_tbl], axis=0)

        out_flat = graphbert_embed_fused(
            x_flat, ids,
            self.emb_w_p.astype(stream_dtype), self.emb_b_p,
            tbl.astype(stream_dtype), self.ln_gamma_p, self.ln_beta_p,
            h_true=h, n_pos=l, n_bins=n_bins, eps=1e-5, tm=self.tm,
            apply_ln=self.layer_norm)
        # dropout p=0 -> identity
        return out_flat[:, :h].reshape(b, l, h)

    # ----- pure-JAX reference for verification -----
    def forward_ref(self, node_features, walks, mask_masked, mask_random,
                    node_in_degree, node_out_degree, rng_key=None):
        b, l = walks.shape
        key = self._rand_key if rng_key is None else rng_key
        x = node_features[walks]
        x = jnp.where(mask_masked[..., None], self.mask_token[0], x)
        rand_idx = jax.random.randint(key, (b, l), 0, node_features.shape[0])
        x = jnp.where(mask_random[..., None], node_features[rand_idx], x)
        y = x @ self.emb_w + self.emb_b
        y = y + self.position_embeddings[:, :l, :]
        if self.use_degree_emb:
            y = y + self._degree_add(node_in_degree, node_out_degree, walks)
        if self.layer_norm:
            mean = jnp.mean(y, axis=-1, keepdims=True)
            var = jnp.mean((y - mean) ** 2, axis=-1, keepdims=True)
            y = (y - mean) / jnp.sqrt(var + 1e-5)
            y = y * self.ln_gamma + self.ln_beta
        return y


# ---------------------------------- main -------------------------------------

if __name__ == "__main__":
    key = jax.random.PRNGKey(0)
    k_param, k_feat, k_walk, k_m1, k_m2, k_din, k_dout = jax.random.split(key, 7)

    in_dim, hidden_dim, max_length = 16, 32, 16
    n_nodes, batch, walk_len = 64, 2, 8

    model = GraphBertEmbeddingsPallas(in_dim, hidden_dim, max_length, k_param)

    node_features = jax.random.normal(k_feat, (n_nodes, in_dim), jnp.float32)
    walks = jax.random.randint(k_walk, (batch, walk_len), 0, n_nodes)
    mask_masked = jax.random.bernoulli(k_m1, 0.15, (batch, walk_len))
    mask_random = jnp.logical_and(
        jax.random.bernoulli(k_m2, 0.15, (batch, walk_len)),
        jnp.logical_not(mask_masked))
    node_in_degree = jax.random.randint(k_din, (n_nodes,), 0, 1000)
    node_out_degree = jax.random.randint(k_dout, (n_nodes,), 0, 1000)

    out = model.forward(node_features, walks, mask_masked, mask_random,
                        node_in_degree, node_out_degree)
    out = jax.block_until_ready(out)

    ref = model.forward_ref(node_features, walks, mask_masked, mask_random,
                            node_in_degree, node_out_degree)
    assert out.shape == (batch, walk_len, hidden_dim)
    assert jnp.allclose(out, ref, atol=1e-4, rtol=1e-4)

    # bf16-stream path (v6e/v7x optimization): halves HBM bytes for x/W/table;
    # LN statistics and the MXU accumulator stay f32.
    out_bf16 = jax.block_until_ready(model.forward(
        node_features, walks, mask_masked, mask_random,
        node_in_degree, node_out_degree, stream_dtype=jnp.bfloat16))
    assert jnp.allclose(out_bf16, ref, atol=1e-1, rtol=1e-1)

    # TODO(synk): data-dependent-count random replacement (x[mask_random] = ...)
    # is emulated with a full-shape jnp.where; the PyTorch module also draws a
    # fresh randint each call, here an explicit rng_key can be passed instead.
    print("KERNEL_OK")
</pallas_src>

<mosaic_0001>
module attributes {stable_mosaic.version = 11 : i64} {
  func.func @_embed_ln_kernel(%arg0: i32, %arg1: memref<16x16xf32, #tpu.memory_space<vmem>>, %arg2: memref<16x3xi32, #tpu.memory_space<vmem>>, %arg3: memref<16x128xf32, #tpu.memory_space<vmem>>, %arg4: memref<1x128xf32, #tpu.memory_space<vmem>>, %arg5: memref<36x128xf32, #tpu.memory_space<vmem>>, %arg6: memref<1x128xf32, #tpu.memory_space<vmem>>, %arg7: memref<1x128xf32, #tpu.memory_space<vmem>>, %arg8: memref<16x128xf32, #tpu.memory_space<vmem>>) attributes {dimension_semantics = [#tpu.dimension_semantics<parallel>], iteration_bounds = array<i64: 1>, scalar_prefetch = 0 : i64, scratch_operands = 0 : i64, tpu.core_type = #tpu.core_type<tc>, window_params = [{transform_indices = @transform_0, window_bounds = array<i64: 16, 16>}, {transform_indices = @transform_1, window_bounds = array<i64: 16, 3>}, {pipeline_mode = #tpu.pipeline_mode<synchronous>, transform_indices = @transform_2, window_bounds = array<i64: 16, 128>}, {pipeline_mode = #tpu.pipeline_mode<synchronous>, transform_indices = @transform_3, window_bounds = array<i64: 1, 128>}, {pipeline_mode = #tpu.pipeline_mode<synchronous>, transform_indices = @transform_4, window_bounds = array<i64: 36, 128>}, {pipeline_mode = #tpu.pipeline_mode<synchronous>, transform_indices = @transform_5, window_bounds = array<i64: 1, 128>}, {pipeline_mode = #tpu.pipeline_mode<synchronous>, transform_indices = @transform_6, window_bounds = array<i64: 1, 128>}, {transform_indices = @transform_7, window_bounds = array<i64: 16, 128>}]} {
    %c0 = arith.constant 0 : index
    %c0_0 = arith.constant 0 : index
    %0 = vector.load %arg1[%c0, %c0_0] : memref<16x16xf32, #tpu.memory_space<vmem>>, vector<16x16xf32>
    %1 = tpu.iota {dimensions = array<i32: 1>} : vector<16x36xi32>
    %c0_1 = arith.constant 0 : index
    %c0_2 = arith.constant 0 : index
    %2 = vector.load %arg2[%c0_1, %c0_2] : memref<16x3xi32, #tpu.memory_space<vmem>>, vector<16x1xi32>
    %3 = vector.broadcast %2 : vector<16x1xi32> to vector<16x36xi32>
    %4 = arith.cmpi eq, %1, %3 : vector<16x36xi32>
    %c0_3 = arith.constant 0 : index
    %c1 = arith.constant 1 : index
    %5 = vector.load %arg2[%c0_3, %c1] : memref<16x3xi32, #tpu.memory_space<vmem>>, vector<16x1xi32>
    %c8_i32 = arith.constant 8 : i32
    %6 = vector.broadcast %c8_i32 : i32 to vector<16x1xi32>
    %7 = arith.addi %5, %6 : vector<16x1xi32>
    %8 = vector.broadcast %7 : vector<16x1xi32> to vector<16x36xi32>
    %9 = arith.cmpi eq, %1, %8 : vector<16x36xi32>
    %10 = arith.ori %4, %9 : vector<16x36xi1>
    %c0_4 = arith.constant 0 : index
    %c2 = arith.constant 2 : index
    %11 = vector.load %arg2[%c0_4, %c2] : memref<16x3xi32, #tpu.memory_space<vmem>>, vector<16x1xi32>
    %c22_i32 = arith.constant 22 : i32
    %12 = vector.broadcast %c22_i32 : i32 to vector<16x1xi32>
    %13 = arith.addi %11, %12 : vector<16x1xi32>
    %14 = vector.broadcast %13 : vector<16x1xi32> to vector<16x36xi32>
    %15 = arith.cmpi eq, %1, %14 : vector<16x36xi32>
    %16 = arith.ori %10, %15 : vector<16x36xi1>
    %17 = arith.extui %16 : vector<16x36xi1> to vector<16x36xi32>
    %18 = arith.sitofp %17 : vector<16x36xi32> to vector<16x36xf32>
    %c0_5 = arith.constant 0 : index
    %c0_6 = arith.constant 0 : index
    %19 = vector.load %arg3[%c0_5, %c0_6] : memref<16x128xf32, #tpu.memory_space<vmem>>, vector<16x128xf32>
    %cst = arith.constant dense<0.000000e+00> : vector<16x128xf32>
    %20 = tpu.matmul %0, %19, %cst {dimension_numbers = #tpu.dot_dimension_numbers<[1], [0], [0], [1], [0, 0, 1, 1], [], []>} : vector<16x16xf32>, vector<16x128xf32>, vector<16x128xf32> -> vector<16x128xf32>
    %c0_7 = arith.constant 0 : index
    %c0_8 = arith.constant 0 : index
    %21 = vector.load %arg5[%c0_7, %c0_8] : memref<36x128xf32, #tpu.memory_space<vmem>>, vector<36x128xf32>
    %cst_9 = arith.constant dense<0.000000e+00> : vector<16x128xf32>
    %22 = tpu.matmul %18, %21, %cst_9 {dimension_numbers = #tpu.dot_dimension_numbers<[1], [0], [0], [1], [0, 0, 1, 1], [], []>} : vector<16x36xf32>, vector<36x128xf32>, vector<16x128xf32> -> vector<16x128xf32>
    %23 = arith.addf %20, %22 : vector<16x128xf32>
    %c0_10 = arith.constant 0 : index
    %c0_11 = arith.constant 0 : index
    %24 = vector.load %arg4[%c0_10, %c0_11] : memref<1x128xf32, #tpu.memory_space<vmem>>, vector<1x128xf32>
    %25 = vector.broadcast %24 : vector<1x128xf32> to vector<16x128xf32>
    %26 = arith.addf %23, %25 : vector<16x128xf32>
    %27 = tpu.iota {dimensions = array<i32: 1>} : vector<1x128xi32>
    %c32_i32 = arith.constant 32 : i32
    %28 = vector.broadcast %c32_i32 : i32 to vector<1x128xi32>
    %29 = arith.cmpi slt, %27, %28 : vector<1x128xi32>
    %30 = arith.extui %29 : vector<1x128xi1> to vector<1x128xi32>
    %31 = arith.sitofp %30 : vector<1x128xi32> to vector<1x128xf32>
    %32 = vector.broadcast %31 : vector<1x128xf32> to vector<16x128xf32>
    %33 = arith.mulf %26, %32 : vector<16x128xf32>
    %cst_12 = arith.constant dense<0.000000e+00> : vector<16xf32>
    %34 = vector.multi_reduction <add>, %33, %cst_12 [1] : vector<16x128xf32> to vector<16xf32>
    %35 = vector.shape_cast %34 : vector<16xf32> to vector<16x1xf32>
    %cst_13 = arith.constant 3.125000e-02 : f32
    %36 = vector.broadcast %cst_13 : f32 to vector<16x1xf32>
    %37 = arith.mulf %35, %36 : vector<16x1xf32>
    %38 = vector.broadcast %37 : vector<16x1xf32> to vector<16x128xf32>
    %39 = arith.subf %33, %38 : vector<16x128xf32>
    %40 = vector.broadcast %31 : vector<1x128xf32> to vector<16x128xf32>
    %41 = arith.mulf %39, %40 : vector<16x128xf32>
    %42 = arith.mulf %41, %41 : vector<16x128xf32>
    %cst_14 = arith.constant dense<0.000000e+00> : vector<16xf32>
    %43 = vector.multi_reduction <add>, %42, %cst_14 [1] : vector<16x128xf32> to vector<16xf32>
    %44 = vector.shape_cast %43 : vector<16xf32> to vector<16x1xf32>
    %cst_15 = arith.constant 3.125000e-02 : f32
    %45 = vector.broadcast %cst_15 : f32 to vector<16x1xf32>
    %46 = arith.mulf %44, %45 : vector<16x1xf32>
    %c0_16 = arith.constant 0 : index
    %c0_17 = arith.constant 0 : index
    %47 = vector.load %arg6[%c0_16, %c0_17] : memref<1x128xf32, #tpu.memory_space<vmem>>, vector<1x128xf32>
    %cst_18 = arith.constant 9.99999974E-6 : f32
    %48 = vector.broadcast %cst_18 : f32 to vector<16x1xf32>
    %49 = arith.addf %46, %48 : vector<16x1xf32>
    %50 = math.rsqrt %49 : vector<16x1xf32>
    %51 = vector.broadcast %47 : vector<1x128xf32> to vector<16x128xf32>
    %52 = vector.broadcast %50 : vector<16x1xf32> to vector<16x128xf32>
    %53 = arith.mulf %51, %52 : vector<16x128xf32>
    %54 = arith.mulf %41, %53 : vector<16x128xf32>
    %c0_19 = arith.constant 0 : index
    %c0_20 = arith.constant 0 : index
    %55 = vector.load %arg7[%c0_19, %c0_20] : memref<1x128xf32, #tpu.memory_space<vmem>>, vector<1x128xf32>
    %56 = vector.broadcast %55 : vector<1x128xf32> to vector<16x128xf32>
    %57 = arith.addf %54, %56 : vector<16x128xf32>
    %c0_21 = arith.constant 0 : index
    %c0_22 = arith.constant 0 : index
    %58 = vector.load %arg8[%c0_21, %c0_22] : memref<16x128xf32, #tpu.memory_space<vmem>>, vector<16x128xf32>
    tpu.vector_store %arg8[%c0_21, %c0_22], %57 {strides = array<i32>} : memref<16x128xf32, #tpu.memory_space<vmem>>, vector<16x128xf32>,
    return
  }
  func.func @transform_0(%arg0: i32) -> (i32, i32) {
    %c0_i32 = arith.constant 0 : i32
    %c0_i32_0 = arith.constant 0 : i32
    return %arg0, %c0_i32 : i32, i32
  }
  func.func @transform_1(%arg0: i32) -> (i32, i32) {
    %c0_i32 = arith.constant 0 : i32
    %c0_i32_0 = arith.constant 0 : i32
    return %arg0, %c0_i32 : i32, i32
  }
  func.func @transform_2(%arg0: i32) -> (i32, i32) {
    %c0_i32 = arith.constant 0 : i32
    %c0_i32_0 = arith.constant 0 : i32
    %c0_i32_1 = arith.constant 0 : i32
    return %c0_i32, %c0_i32_0 : i32, i32
  }
  func.func @transform_3(%arg0: i32) -> (i32, i32) {
    %c0_i32 = arith.constant 0 : i32
    %c0_i32_0 = arith.constant 0 : i32
    %c0_i32_1 = arith.constant 0 : i32
    return %c0_i32, %c0_i32_0 : i32, i32
  }
  func.func @transform_4(%arg0: i32) -> (i32, i32) {
    %c0_i32 = arith.constant 0 : i32
    %c0_i32_0 = arith.constant 0 : i32
    %c0_i32_1 = arith.constant 0 : i32
    return %c0_i32, %c0_i32_0 : i32, i32
  }
  func.func @transform_5(%arg0: i32) -> (i32, i32) {
    %c0_i32 = arith.constant 0 : i32
    %c0_i32_0 = arith.constant 0 : i32
    %c0_i32_1 = arith.constant 0 : i32
    return %c0_i32, %c0_i32_0 : i32, i32
  }
  func.func @transform_6(%arg0: i32) -> (i32, i32) {
    %c0_i32 = arith.constant 0 : i32
    %c0_i32_0 = arith.constant 0 : i32
    %c0_i32_1 = arith.constant 0 : i32
    return %c0_i32, %c0_i32_0 : i32, i32
  }
  func.func @transform_7(%arg0: i32) -> (i32, i32) {
    %c0_i32 = arith.constant 0 : i32
    %c0_i32_0 = arith.constant 0 : i32
    return %arg0, %c0_i32 : i32, i32
  }
}

</mosaic_0001>

<bundles_post_ra>
// kernel: tpu_custom_call.1
= control target key start
LH: loop header
LB: loop body
LE: loop exit
PB: predicated region body
PF: predicated region fallthrough
CT: control target
= control target key end

     0   :  { %12 = vsyncpa [#allocation3], 0  ;;  %s610_s0 = inlined_call_operand.vmem [shape: f32[16,16], index: 0, kind: input, shape index: {}]   ;;  %s611_s1 = inlined_call_operand.vmem [shape: s32[16,3], index: 1, kind: input, shape index: {}]   ;;  %s612_s2 = inlined_call_operand.hbm [shape: f32[16,128], index: 2, kind: input, shape index: {}]   ;;  %s613_s3 = inlined_call_operand.vmem [shape: f32[1,128], index: 3, kind: input, shape index: {}]   ;;  %s614_s4 = inlined_call_operand.hbm [shape: f32[36,128], index: 4, kind: input, shape index: {}]   ;;  %s615_s5 = inlined_call_operand.vmem [shape: f32[1,128], index: 5, kind: input, shape index: {}]   ;;  %s616_s6 = inlined_call_operand.vmem [shape: f32[1,128], index: 6, kind: input, shape index: {}]   ;;  %s617_s7 = inlined_call_operand.hbm [shape: f32[16,128], index: 7, kind: output, shape index: {}]  }
   0x1   :  { %13 = vsyncpa [#allocation6], 0 }
   0x2   :  { %14 = vsyncpa [#allocation4], 0  ;;  %s495_s24 = smov [#allocation2]   ;;  %s423_s28 = scalar_lea.hbm %s612_s2, 256 }
   0x3   :  { %s24_s25 = sshll.u32 %s495_s24, 4  ;;  %p424_p0 = scmp.ne.s32.totalorder %s612_s2, %s423_s28  ;;  %s25_s25 = int_to_ptr.vmem [resolvable:$true] %s24_s25 }
   0x4   :  { %p427_p1 = scmp.lt.u32.totalorder %s423_s28, %s612_s2 }
   0x6   :  { %p429_p2 = pnand %p427_p1, %p424_p0 }
   0x8   :  { %432 = shalt.err (!%p429_p2)
}
   0x9   :  { %s433_s10 = scalar_lea.vmem %s25_s25, 256  ;;  %p438_p4 = scmp.lt.s32.totalorder %s25_s25, %s25_s25 }
   0xa   :  { %p434_p3 = scmp.ne.s32.totalorder %s25_s25, %s433_s10  ;;  %p439_p5 = scmp.lt.s32.totalorder %s433_s10, %s433_s10 }
   0xc   :  { %p440_p6 = por %p439_p5, %p438_p4 }
   0xe   :  { %p441_p7 = pnand %p440_p6, %p434_p3 }
  0x10   :  { %444 = shalt.err (!%p441_p7)
}
  0x11   :  { %s496_s11 = smov 128   ;;  %s497_s12 = smov 8  }
  0x12   :  { %30 = dma.hbm_to_vmem [thread:$0]  %s612_s2, 256, %s25_s25, [#allocation3], %s496_s11, %s496_s11, %s497_s12  }
  0x13   :  { %s498_s15 = smov [#allocation5]   ;;  %s445_s19 = scalar_lea.hbm %s614_s4, 640 }
  0x14   :  { %s38_s16 = sshll.u32 %s498_s15, 4  ;;  %p446_p8 = scmp.ne.s32.totalorder %s614_s4, %s445_s19  ;;  %s39_s16 = int_to_ptr.vmem [resolvable:$true] %s38_s16 }
  0x15   :  { %p449_p9 = scmp.lt.u32.totalorder %s445_s19, %s614_s4 }
  0x17   :  { %p451_p10 = pnand %p449_p9, %p446_p8 }
  0x19   :  { %454 = shalt.err (!%p451_p10)
}
  0x1a   :  { %s455_s24 = scalar_lea.vmem %s39_s16, 640  ;;  %p460_p12 = scmp.lt.s32.totalorder %s39_s16, %s39_s16 }
  0x1b   :  { %p456_p11 = scmp.ne.s32.totalorder %s39_s16, %s455_s24  ;;  %p461_p13 = scmp.lt.s32.totalorder %s455_s24, %s455_s24 }
  0x1d   :  { %p462_p0 = por %p461_p13, %p460_p12 }
  0x1f   :  { %p463_p1 = pnand %p462_p0, %p456_p11 }
  0x21   :  { %466 = shalt.err (!%p463_p1)
}
  0x22   :  { %44 = dma.hbm_to_vmem [thread:$0]  %s614_s4, 640, %s39_s16, [#allocation6], %s496_s11, %s496_s11, %s497_s12  }
  0x23   :  { %489 = dma.done.wait [#allocation3], 256  }
  0x24   :  { %490 = vsyncadd [#allocation3], 4294967040 }
  0x25   :  { %491 = dma.done.wait [#allocation6], 640  }
  0x26   :  { %492 = vsyncadd [#allocation6], 4294966656  ;;  %v499_v0 = vmov 0   ;;  %v60_v1 = vld [vmem:[%s611_s1 + $0x8] sm:$0xff]  ;;  %v59_v2 = vld [vmem:[%s611_s1] sm:$0xff]  ;;  %v500_v8 = vmov 1   ;;  %v57_v23 = vlaneseq }
  0x27   :  { %414 = vset.pattern.permute.xlu1 %v499_v0  ;;  %413 = vset.pattern.permute.xlu0 %v499_v0  ;;  %v99_v3 = vld [vmem:[#allocation5] sm:$0xff]  ;;  %v100_v4 = vld [vmem:[#allocation5 + $0x8] sm:$0xff]  ;;  %v70_v5 = vadd.s32 8, %v60_v1  ;;  %v69_v6 = vadd.s32 8, %v59_v2  ;;  %v81_v9 = vadd.s32 22, %v59_v2  ;;  %v82_v10 = vadd.s32 22, %v60_v1 }
  0x28   :  { %65 = vperm.xlu1 %414, %v60_v1   ;;  %62 = vperm.xlu0 %413, %v59_v2   ;;  %v390_v7 = vpack.c.bf16 %v100_v4, %v99_v3  ;;  %v101_v11 = vld [vmem:[#allocation5 + $0x10] sm:$0xff]  ;;  %v102_v12 = vld [vmem:[#allocation5 + $0x18] sm:$0xff]  ;;  %v501_v17 = vmov 2   ;;  %v103_v18 = vld [vmem:[#allocation5 + $0x20] sm:$0xf]  ;;  %vm111_vm0 = vcmask 1043456  }
  0x29   :  { %v394_v13 = vpack.c.bf16 %v102_v12, %v101_v11  ;;  %v97_v14 = vld [vmem:[#allocation2] sm:$0xff]  ;;  %v98_v15 = vld [vmem:[#allocation2 + $0x8] sm:$0xff]  ;;  %vm190_vm1 = vcmask 130048   ;;  %v58_v24 = vand.u32 127, %v57_v23  ;;  %vm104_vm11 = vcmask 293888   ;;  %s503_s15 = smov [#allocation7]  }
  0x2a   :  { %391 = vmatprep.subr.bf16.mxu1 %v390_v7  ;;  %v398_v16 = vpack.c.bf16 %v98_v15, %v97_v14  ;;  %v55_v19 = vld [vmem:[%s610_s0] sm:$0xff]  ;;  %v56_v20 = vld [vmem:[%s610_s0 + $0x8] sm:$0xff]  ;;  %v502_v29 = vmov 0.0   ;;  %s335_s16 = sshll.u32 %s503_s15, 4  ;;  %s336_s16 = int_to_ptr.vmem [resolvable:$true] %s335_s16 }
  0x2b   :  { %393 = vmatpush3.bf16.msra.mxu1 %v390_v7  ;;  %387 = vmatprep.mubr.msk.f32.mxu0 %vm190_vm1, %v55_v19  ;;  %vm281_vm13 = vcmp.lt.s32.totalorder %v58_v24, 32  ;;  %v355_v35 = vld [vmem:[%s613_s3] ss:$0 sm:$0xff]  ;;  %s467_s17 = scalar_lea.vmem %s336_s16, 256  ;;  %p472_p3 = scmp.lt.s32.totalorder %s336_s16, %s336_s16 }
  0x2c   :  { %416 = vset.pattern.permute.xlu1 %v500_v8  ;;  %415 = vset.pattern.permute.xlu0 %v500_v8  ;;  %v356_v39 = vsel %vm281_vm13, 1.0, %v502_v29  ;;  %v357_v60 = vld [vmem:[%s615_s5] ss:$0 sm:$0xff]  ;;  %p468_p2 = scmp.ne.s32.totalorder %s336_s16, %s467_s17  ;;  %p473_p4 = scmp.lt.s32.totalorder %s467_s17, %s467_s17 }
  0x2d   :  { %75 = vperm.xlu1 %416, %v70_v5   ;;  %72 = vperm.xlu0 %415, %v69_v6   ;;  %v358_v1 = vld [vmem:[%s616_s6] ss:$0 sm:$0xff] }
  0x2e   :  { %395 = vmatprep.subr.bf16.mxu1 %v394_v13  ;;  %399 = vmatprep.subr.bf16.mxu0 %v398_v16  ;;  %p474_p5 = por %p473_p4, %p472_p3 }
  0x2f   :  { %397 = vmatpush3.bf16.msra.mxu1 %v394_v13  ;;  %401 = vmatpush3.bf16.msra.mxu0 %v398_v16 }
  0x30   :  { %378 = vmatprep.subr.msk.mxu1 %vm111_vm0, %v103_v18  ;;  %p475_p6 = pnand %p474_p5, %p468_p2 }
  0x31   :  { %417 = vset.pattern.permute.xlu1 %v501_v17  ;;  %418 = vset.pattern.permute.xlu0 %v501_v17 }
  0x32   :  { %84 = vperm.xlu1 %417, %v81_v9   ;;  %87 = vperm.xlu0 %418, %v82_v10  }
  0x33   :  { %388 = vmatmul.mubr.msk.f32.vlgmr.msra.gmra.mrb[0].mxu0 %vm190_vm1, %v56_v20  ;;  %379 = vmatpush3.msk.msra.mxu1 %vm111_vm0, %v103_v18 }
  0xa7   :  { %v66_v21 = vpop.permute.xlu1 %65  ;;  %v63_v22 = vpop.permute.xlu0 %62 }
  0xa8   :  { %vm68_vm4 = vcmp.eq.s32.totalorder %v58_v24, %v66_v21  ;;  %vm67_vm5 = vcmp.eq.s32.totalorder %v58_v24, %v63_v22 }
  0xac   :  { %v76_v25 = vpop.permute.xlu1 %75  ;;  %v73_v26 = vpop.permute.xlu0 %72 }
  0xad   :  { %vm78_vm2 = vcmp.eq.s32.totalorder %v58_v24, %v76_v25  ;;  %vm77_vm3 = vcmp.eq.s32.totalorder %v58_v24, %v73_v26 }
  0xae   :  { %vm80_vm6 = vmor %vm68_vm4, %vm78_vm2 }
  0xaf   :  { %vm79_vm7 = vmor %vm67_vm5, %vm77_vm3 }
  0xb1   :  { %v85_v27 = vpop.permute.xlu1 %84  ;;  %v88_v28 = vpop.permute.xlu0 %87 }
  0xb2   :  { %vm89_vm8 = vcmp.eq.s32.totalorder %v58_v24, %v85_v27  ;;  %vm90_vm9 = vcmp.eq.s32.totalorder %v58_v24, %v88_v28 }
  0xb3   :  { %vm92_vm10 = vmor %vm80_vm6, %vm90_vm9 }
  0xb4   :  { %v349_v30 = vsel %vm92_vm10, 1.0, %v502_v29  ;;  %vm91_vm12 = vmor %vm79_vm7, %vm89_vm8 }
  0xb5   :  { %v348_v31 = vsel %vm91_vm12, 1.0, %v502_v29 }
  0xb6   :  { %380 = vmatprep.mubr.msk.f32.mxu1 %vm104_vm11, %v348_v31 }
  0xb7   :  { %381 = vmatmul.mubr.msk.f32.vlgmr.msra.gmra.mrb[0].mxu1 %vm104_vm11, %v349_v30 }
 0x106   :  { %v389_v32 = vpop.f32.mrb[0].mxu0 }
 0x107   :  { %v263_v33 = vpop.f32.mrb[1].mxu0 }
 0x18a   :  { %v382_v34 = vpop.f32.mrb[0].mxu1 }
 0x18b   :  { %v269_v36 = vadd.f32 %v389_v32, %v382_v34  ;;  %v181_v37 = vpop.f32.mrb[1].mxu1 }
 0x18c   :  { %v264_v38 = vadd.f32 %v263_v33, %v181_v37 }
 0x18d   :  { %v280_v40 = vadd.f32 %v355_v35, %v269_v36 }
 0x18e   :  { %v279_v41 = vadd.f32 %v355_v35, %v264_v38 }
 0x18f   :  { %v285_v42 = vmul.f32 %v356_v39, %v280_v40 }
 0x190   :  { %v284_v43 = vmul.f32 %v356_v39, %v279_v41 }
 0x191   :  { %288 = vadd.xlane.f32.xlu0 %v285_v42 }
 0x192   :  { %286 = vadd.xlane.f32.xlu1 %v284_v43 }
 0x21e   :  { %v289_v44 = vpop.xlane.xlu0 %288 }
 0x21f   :  { %v291_v45 = vmul.f32 0.03125, %v289_v44  ;;  %v287_v46 = vpop.xlane.xlu1 %286 }
 0x220   :  { %v290_v47 = vmul.f32 0.03125, %v287_v46 }
 0x221   :  { %v293_v48 = vsub.f32 %v285_v42, %v291_v45 }
 0x222   :  { %v292_v49 = vsub.f32 %v284_v43, %v290_v47 }
 0x223   :  { %v295_v50 = vmul.f32 %v356_v39, %v293_v48 }
 0x224   :  { %v294_v51 = vmul.f32 %v356_v39, %v292_v49 }
 0x225   :  { %v297_v52 = vmul.f32 %v295_v50, %v295_v50 }
 0x226   :  { %v296_v53 = vmul.f32 %v294_v51, %v294_v51 }
 0x227   :  { %300 = vadd.xlane.f32.xlu0 %v297_v52 }
 0x228   :  { %298 = vadd.xlane.f32.xlu1 %v296_v53 }
 0x2b4   :  { %v301_v54 = vpop.xlane.xlu0 %300 }
 0x2b5   :  { %v303_v55 = vmul.f32 0.03125, %v301_v54  ;;  %v299_v56 = vpop.xlane.xlu1 %298 }
 0x2b6   :  { %v302_v57 = vmul.f32 0.03125, %v299_v56 }
 0x2b7   :  { %v306_v58 = vadd.f32 1e-05, %v303_v55 }
 0x2b8   :  { %v305_v59 = vadd.f32 1e-05, %v302_v57 }
 0x2b9   :  { %419 = vrsqrt.f32 %v306_v58 }
 0x2ba   :  { %421 = vrsqrt.f32 %v305_v59 }
 0x2c3   :  { %v420_v61 = vpop.eup %419 }
 0x2c4   :  { %v422_v62 = vpop.eup %421  ;;  %v316_v63 = vmul.f32 %v420_v61, %v357_v60 }
 0x2c5   :  { %v315_v0 = vmul.f32 %v422_v62, %v357_v60 }
 0x2c6   :  { %v318_v2 = vmul.f32 %v316_v63, %v295_v50 }
 0x2c7   :  { %v317_v3 = vmul.f32 %v315_v0, %v294_v51 }
 0x2c8   :  { %v327_v4 = vadd.f32 %v358_v1, %v318_v2 }
 0x2c9   :  { %v326_v5 = vadd.f32 %v358_v1, %v317_v3 }
 0x2ca   :  { %329 = vst [vmem:[#allocation7 + $0x8] sm:$0xff] %v327_v4 }
 0x2cb   :  { %328 = vst [vmem:[#allocation7] sm:$0xff] %v326_v5 }
 0x2cc   :  { %478 = shalt.err (!%p475_p6)
}
 0x2cd   :  { %s479_s6 = scalar_lea.hbm %s617_s7, 256 }
 0x2ce   :  { %p480_p7 = scmp.ne.s32.totalorder %s617_s7, %s479_s6  ;;  %p483_p8 = scmp.lt.u32.totalorder %s479_s6, %s617_s7 }
 0x2d0   :  { %p485_p9 = pnand %p483_p8, %p480_p7 }
 0x2d2   :  { %488 = shalt.err (!%p485_p9)
}
 0x2d3   :  { %341 = dma.vmem_to_hbm [thread:$0]  %s336_s16, 256, %s617_s7, [#allocation4], %s496_s11, %s496_s11, %s497_s12  }
 0x2d4   :  { %493 = dma.done.wait [#allocation4], 256  }
 0x2d5   :  { %494 = vsyncadd [#allocation4], 4294967040 }
 0x2d6   :  { %345 = vsyncpa [#allocation3], 1 }
 0x2d7   :  { %346 = vsyncpa [#allocation6], 1 }
 0x2d8   :  { %347 = vsyncpa [#allocation4], 1 }

</bundles_post_ra>
